<compile_context>
chip_gen: v5e
topology: v5e:2x2
jax: 0.10.0
libtpu: 0.0.40
codegen_flags: <defaults>
</compile_context>

<pallas_src>
import jax
import jax.numpy as jnp
from jax.experimental import pallas as pl
from jax.experimental.pallas import tpu as pltpu

# ----------------------------- configuration -----------------------------
MIN_NUM_PATCHES = 16

BATCH       = 2
CHANNELS    = 4
IMAGE_SIZE  = 20          # 20 / 4 = 5  ->  25 patches  (> MIN_NUM_PATCHES)
PATCH_SIZE  = 4
H_DIM       = 32          # args.h_dim
NUM_CLASSES = 10

NUM_PATCHES = (IMAGE_SIZE // PATCH_SIZE) ** 2          # 25
PATCH_DIM   = CHANNELS * PATCH_SIZE ** 2               # 64
SEQ_LEN     = NUM_PATCHES + 1                          # 26  (cls + patches)

assert IMAGE_SIZE % PATCH_SIZE == 0, 'Image dimensions must be divisible by the patch size.'
assert NUM_PATCHES > MIN_NUM_PATCHES


def _round_up(x, m):
    return (x + m - 1) // m * m


# (8, 128)-friendly padded shapes.
TOK_PAD = _round_up(SEQ_LEN, 8)        # 32 token slots per batch (cls slot + patches + pad)
B_PAD   = _round_up(BATCH, 8)          # 8  logits rows  (sublane-aligned head matmul)
N_PAD   = _round_up(NUM_CLASSES, 128)  # 128 logits lanes (unmasked lane-dense vst)


# ----------------------------- Pallas kernel -----------------------------
def _fused_vit_kernel(patches_ref, w_emb_ref, b_emb_ref, cls_ref,
                      w_head_ref, b_head_ref, logits_ref):
    """Single-invocation fused forward; only the logits slab is written out.

    patches_ref : (BATCH*TOK_PAD, PATCH_DIM)  per batch: row 0 = zero placeholder
                  (cls slot), rows 1..NUM_PATCHES = patches, rest zero pad
    w_emb_ref   : (PATCH_DIM, H_DIM)
    b_emb_ref   : (1, H_DIM)
    cls_ref     : (1, H_DIM)
    w_head_ref  : (H_DIM, N_PAD)   columns >= NUM_CLASSES are zero
    b_head_ref  : (1, N_PAD)       columns >= NUM_CLASSES are zero
    logits_ref  : (B_PAD, N_PAD)   out: lane-dense logits slab
    """
    # --- patch_to_embedding: one MXU matmul over all (padded) token rows -----
    emb = jnp.dot(patches_ref[...], w_emb_ref[...],
                  preferred_element_type=jnp.float32) + b_emb_ref[...]

    # --- x = cat([cls_tokens, patch_embeddings], dim=1), built as a VALUE ----
    # (single select on the VPU; no masked sub-8-row stores, no seq HBM output)
    cls_full = jnp.broadcast_to(cls_ref[...], (BATCH * TOK_PAD, H_DIM))
    row = jax.lax.broadcasted_iota(jnp.int32, (BATCH * TOK_PAD, H_DIM), 0) % TOK_PAD
    x = jnp.where(row == 0, cls_full, jnp.where(row < SEQ_LEN, emb, 0.0))

    # TODO(synk): `self.net` is an external module injected via the constructor
    # and undefined in the reference script; it is applied as the identity here.

    # --- mlp_head on x[:, 0] --------------------------------------------------
    # Under the identity `net`, row 0 of every TOK_PAD block of `x` is exactly
    # the cls token, so the (B_PAD, H_DIM) head input is built directly in
    # registers — no readback from an output ref and no 1-row concatenates.
    # (This also makes `emb` / `x` dead code, which the compiler removes.)
    del x
    x0 = jnp.broadcast_to(cls_ref[...], (B_PAD, H_DIM))
    logits_ref[...] = (jnp.dot(x0, w_head_ref[...],
                               preferred_element_type=jnp.float32)
                       + b_head_ref[...])


def _fused_forward(patches2d, w_emb, b_emb, cls2d, w_head, b_head):
    vmem = pltpu.MemorySpace.VMEM
    flops = 2 * (BATCH * TOK_PAD) * PATCH_DIM * H_DIM + 2 * B_PAD * H_DIM * N_PAD
    bytes_accessed = 4 * (BATCH * TOK_PAD * PATCH_DIM   # patches
                          + PATCH_DIM * H_DIM + H_DIM    # w_emb, b_emb
                          + H_DIM                        # cls
                          + H_DIM * N_PAD + N_PAD        # w_head, b_head
                          + B_PAD * N_PAD)               # logits out
    return pl.pallas_call(
        _fused_vit_kernel,
        out_shape=jax.ShapeDtypeStruct((B_PAD, N_PAD), jnp.float32),
        in_specs=[pl.BlockSpec(memory_space=vmem) for _ in range(6)],
        out_specs=pl.BlockSpec(memory_space=vmem),
        cost_estimate=pl.CostEstimate(flops=flops, transcendentals=0,
                                      bytes_accessed=bytes_accessed),
    )(patches2d, w_emb, b_emb, cls2d, w_head, b_head)


# ----------------------------- parameter init ----------------------------
def init_params(key):
    k1, k2, k3, k4, k5 = jax.random.split(key, 5)
    # nn.Linear(patch_dim, h_dim): stored as (K, N) so the kernel computes x @ W
    w_emb = jax.random.normal(k1, (PATCH_DIM, H_DIM), jnp.float32) * 0.02
    b_emb = jax.random.normal(k2, (1, H_DIM), jnp.float32) * 0.02
    # cls_token: nn.Parameter(torch.randn(1, 1, h_dim))
    cls_token = jax.random.normal(k3, (1, 1, H_DIM), jnp.float32)
    # nn.Linear(h_dim, num_classes): zero-padded to a lane-dense 128-wide slab
    w_head = jax.random.normal(k4, (H_DIM, NUM_CLASSES), jnp.float32) * 0.02
    b_head = jax.random.normal(k5, (1, NUM_CLASSES), jnp.float32) * 0.02
    w_head_pad = jnp.zeros((H_DIM, N_PAD), jnp.float32).at[:, :NUM_CLASSES].set(w_head)
    b_head_pad = jnp.zeros((1, N_PAD), jnp.float32).at[:, :NUM_CLASSES].set(b_head)
    return dict(w_emb=w_emb, b_emb=b_emb, cls_token=cls_token,
                w_head=w_head_pad, b_head=b_head_pad)


# ----------------------------- forward pass ------------------------------
@jax.jit
def forward(img, params, mask=None):
    """img: (b, c, H, W) float32 -> logits (b, num_classes)."""
    del mask  # accepted but unused, matching the reference forward
    p = PATCH_SIZE
    b, c, H, W = img.shape
    assert b == BATCH and c == CHANNELS
    h, w = H // p, W // p

    # rearrange 'b c (h p1) (w p2) -> b (h w) (p1 p2 c)'  (XLA glue)
    x = img.reshape(b, c, h, p, w, p)
    x = jnp.transpose(x, (0, 2, 4, 3, 5, 1))          # b h w p1 p2 c
    x = x.reshape(b, h * w, p * p * c)                # (b, n, patch_dim)

    # Pad the token axis: 1 leading zero row (the cls slot) + trailing zeros to
    # a sublane-aligned count, then flatten to a 2-D slab for the fused kernel.
    x = jnp.pad(x, ((0, 0), (1, TOK_PAD - 1 - h * w), (0, 0)))
    patches2d = x.reshape(b * TOK_PAD, p * p * c)     # (b*TOK_PAD, patch_dim)

    cls2d = params['cls_token'].reshape(1, H_DIM)
    logits_pad = _fused_forward(patches2d, params['w_emb'], params['b_emb'],
                                cls2d, params['w_head'], params['b_head'])
    return logits_pad[:b, :NUM_CLASSES]


# --------------------------------- main ----------------------------------
if __name__ == "__main__":
    key = jax.random.PRNGKey(0)
    pkey, xkey = jax.random.split(key)
    params = init_params(pkey)
    img = jax.random.normal(xkey, (BATCH, CHANNELS, IMAGE_SIZE, IMAGE_SIZE), jnp.float32)

    out = forward(img, params)
    jax.block_until_ready(out)
    assert out.shape == (BATCH, NUM_CLASSES)
    print("KERNEL_OK")
</pallas_src>

<mosaic_0001>
module attributes {stable_mosaic.version = 11 : i64} {
  func.func @_fused_vit_kernel(%arg0: memref<64x64xf32, #tpu.memory_space<vmem>>, %arg1: memref<64x32xf32, #tpu.memory_space<vmem>>, %arg2: memref<1x32xf32, #tpu.memory_space<vmem>>, %arg3: memref<1x32xf32, #tpu.memory_space<vmem>>, %arg4: memref<32x128xf32, #tpu.memory_space<vmem>>, %arg5: memref<1x128xf32, #tpu.memory_space<vmem>>, %arg6: memref<8x128xf32, #tpu.memory_space<vmem>>) attributes {dimension_semantics = [], scalar_prefetch = 0 : i64, scratch_operands = 0 : i64, tpu.core_type = #tpu.core_type<tc>} {
    %c0 = arith.constant 0 : index
    %c0_0 = arith.constant 0 : index
    %0 = vector.load %arg3[%c0, %c0_0] : memref<1x32xf32, #tpu.memory_space<vmem>>, vector<1x32xf32>
    %1 = vector.shape_cast %0 : vector<1x32xf32> to vector<1x32xf32>
    %2 = vector.broadcast %1 : vector<1x32xf32> to vector<8x32xf32>
    %c0_1 = arith.constant 0 : index
    %c0_2 = arith.constant 0 : index
    %3 = vector.load %arg4[%c0_1, %c0_2] : memref<32x128xf32, #tpu.memory_space<vmem>>, vector<32x128xf32>
    %cst = arith.constant dense<0.000000e+00> : vector<8x128xf32>
    %4 = tpu.matmul %2, %3, %cst {dimension_numbers = #tpu.dot_dimension_numbers<[1], [0], [0], [1], [0, 0, 1, 1], [], []>} : vector<8x32xf32>, vector<32x128xf32>, vector<8x128xf32> -> vector<8x128xf32>
    %c0_3 = arith.constant 0 : index
    %c0_4 = arith.constant 0 : index
    %5 = vector.load %arg5[%c0_3, %c0_4] : memref<1x128xf32, #tpu.memory_space<vmem>>, vector<1x128xf32>
    %6 = vector.broadcast %5 : vector<1x128xf32> to vector<8x128xf32>
    %7 = arith.addf %4, %6 : vector<8x128xf32>
    %c0_5 = arith.constant 0 : index
    %c0_6 = arith.constant 0 : index
    %8 = vector.load %arg6[%c0_5, %c0_6] : memref<8x128xf32, #tpu.memory_space<vmem>>, vector<8x128xf32>
    tpu.vector_store %arg6[%c0_5, %c0_6], %7 {strides = array<i32>} : memref<8x128xf32, #tpu.memory_space<vmem>>, vector<8x128xf32>,
    return
  }
}

</mosaic_0001>

<bundles_post_ra>
// kernel: forward.1
= control target key start
LH: loop header
LB: loop body
LE: loop exit
PB: predicated region body
PF: predicated region fallthrough
CT: control target
= control target key end

     0   :  { %vm34_vm0 = vcmask 261120   ;;  %s121_s0 = inlined_call_operand.vmem [shape: f32[64,64], index: 0, kind: input, shape index: {}]   ;;  %s122_s1 = inlined_call_operand.vmem [shape: f32[64,32], index: 1, kind: input, shape index: {}]   ;;  %s123_s2 = inlined_call_operand.vmem [shape: f32[1,32], index: 2, kind: input, shape index: {}]   ;;  %s124_s4 = inlined_call_operand.vmem [shape: f32[32,128], index: 4, kind: input, shape index: {}]   ;;  %s125_s3 = inlined_call_operand.vmem [shape: f32[1,32], index: 3, kind: input, shape index: {}]   ;;  %s126_s5 = inlined_call_operand.vmem [shape: f32[1,128], index: 5, kind: input, shape index: {}]   ;;  %s127_s6 = inlined_call_operand.vmem [shape: f32[8,128], index: 6, kind: output, shape index: {}]  }
   0x1   :  { %v29_v0 = vld [vmem:[%s124_s4 + $0x18] sm:$0xff]  ;;  %v28_v1 = vld [vmem:[%s124_s4 + $0x10] sm:$0xff]  ;;  %v27_v2 = vld [vmem:[%s124_s4 + $0x8] sm:$0xff] }
   0x2   :  { %49 = vmatpush.msra.mxu0 %v29_v0  ;;  %v26_v3 = vld [vmem:[%s124_s4] sm:$0xff] }
   0x3   :  { %v63_v4 = vld [vmem:[%s125_s3] ss:$0 sm:$0xff] }
   0x4   :  { %50 = vmatpush.msra.mxu0 %v28_v1  ;;  %v64_v5 = vld [vmem:[%s126_s5] ss:$0 sm:$0xff] }
   0x6   :  { %51 = vmatpush.msra.mxu0 %v27_v2 }
   0x8   :  { %52 = vmatpush.msra.mxu0 %v26_v3 }
   0x9   :  { %62 = vmatmul.msk.f32.vlgmr.msra.gmra.mxu0 %vm34_vm0, %v63_v4 }
  0x86   :  { %v54_v6 = vpop.f32.mrf.mxu0 }
  0x87   :  { %v55_v7 = vadd.f32 %v64_v5, %v54_v6 }
  0x89   :  { %57 = vst [vmem:[%s127_s6] sm:$0xff] %v55_v7 }

</bundles_post_ra>
